<compile_context>
chip_gen: v6e
topology: v6e:2x2x1
jax: 0.10.0
libtpu: 0.0.40
codegen_flags: <defaults>
</compile_context>

<pallas_src>
import functools

import jax
import jax.numpy as jnp
from jax.experimental import pallas as pl
from jax.experimental.pallas import tpu as pltpu

NEG_SLOPE = 0.2      # GATConv default LeakyReLU negative slope
LANE = 128           # lane width / feature padding target
NEG_INF = -1e30      # finite "-inf" (avoids inf-inf NaNs in online softmax)
MASK_BIG = 1e30      # additive mask magnitude


def _round_up(v, m):
    return (v + m - 1) // m * m


def _pad_to(arr, shape):
    pads = [(0, s - d) for d, s in zip(arr.shape, shape)]
    return jnp.pad(arr, pads)


def _pick_tile(n_pad):
    for t in (512, 256, 128):
        if n_pad % t == 0:
            return t
    return LANE


def _row_semantics(n_row_blocks):
    """Use CORE_PARALLEL on v7x (2 TensorCores) when the row axis splits evenly."""
    kind = ""
    try:
        kind = jax.devices()[0].device_kind.lower()
    except Exception:
        pass
    if ("v7" in kind or "7x" in kind) and n_row_blocks % 2 == 0:
        return pltpu.CORE_PARALLEL
    return pltpu.PARALLEL


# --------------------------------------------------------------------------
# Kernel 1: projection  h = x @ W   plus per-node attention scores
#   scores[:, 0] = h . a_src   scores[:, 1] = h . a_dst   (lane-dense MXU out)
# --------------------------------------------------------------------------
def _proj_kernel(x_ref, w_ref, acat_ref, h_ref, sc_ref):
    x = x_ref[...].astype(jnp.bfloat16)
    w = w_ref[...].astype(jnp.bfloat16)
    h = jnp.dot(x, w, preferred_element_type=jnp.float32).astype(jnp.bfloat16)
    h_ref[...] = h
    sc_ref[...] = jnp.dot(h, acat_ref[...], preferred_element_type=jnp.float32)


# --------------------------------------------------------------------------
# Kernel 2: masked-softmax attention + aggregation (flash-style, tiled,
#           block-sparse skipping via scalar-prefetched per-block edge counts)
#   grid = (row blocks qi, source blocks ki); ki is the reduction axis and is
#   rotated so ki==0 is the diagonal (self-loop) block for every qi.
# --------------------------------------------------------------------------
def _gat_attn_kernel(cnt_ref, d_ref, s_ref, hk_ref, bias_ref, adj_ref, out_ref,
                     m_sc, l_sc, acc_sc, *, apply_relu, nk):
    qi = pl.program_id(0)
    ki = pl.program_id(1)

    @pl.when(ki == 0)
    def _init():
        m_sc[...] = jnp.full_like(m_sc, NEG_INF)
        l_sc[...] = jnp.zeros_like(l_sc)
        acc_sc[...] = jnp.zeros_like(acc_sc)

    # Skip tiles with no edges.  ki==0 is the diagonal block (self loops) so it
    # always runs -> m is finite from the first step, so exp(e - m) underflows
    # to exactly 0 for masked entries and no jnp.where masking is needed.
    @pl.when(cnt_ref[qi * nk + ki] > 0)
    def _update():
        hk = hk_ref[...]                                      # (tk, Fp) bf16
        e0 = d_ref[...] + s_ref[...]                          # (tq, tk) raw logits
        e = jnp.where(e0 > 0, e0, NEG_SLOPE * e0)             # LeakyReLU
        e = e + (adj_ref[...].astype(jnp.float32) - 1.0) * MASK_BIG  # additive mask

        m_prev = m_sc[...]
        m_new = jnp.maximum(m_prev, jnp.max(e, axis=-1, keepdims=True))
        scale = jnp.exp(m_prev - m_new)
        p = jnp.exp(e - m_new)                                # masked -> exactly 0
        l_sc[...] = scale * l_sc[...] + jnp.sum(p, axis=-1, keepdims=True)
        acc_sc[...] = scale * acc_sc[...] + jnp.dot(
            p.astype(jnp.bfloat16), hk, preferred_element_type=jnp.float32)
        m_sc[...] = m_new

    @pl.when(ki == pl.num_programs(1) - 1)
    def _finalize():
        inv_l = pl.reciprocal(l_sc[...], approx=True)         # EUP, ~2^-11 rel err
        out = acc_sc[...] * inv_l + bias_ref[...]
        if apply_relu:
            out = jnp.maximum(out, 0.0)
        out_ref[...] = out.astype(out_ref.dtype)


# --------------------------------------------------------------------------
# One GAT layer (projection + attention) on padded, lane-dense arrays.
# --------------------------------------------------------------------------
def gat_layer(x, w, a_cat, bias, adj, cnt_flat, *, t_blk, apply_relu, out_dtype):
    n_pad, f_in_pad = x.shape
    f_pad = w.shape[1]
    t = t_blk
    n_blk = n_pad // t
    row_sem = _row_semantics(n_blk)

    # ---- projection kernel (h + hoisted per-node scores) -------------------
    h, scores = pl.pallas_call(
        _proj_kernel,
        out_shape=(jax.ShapeDtypeStruct((n_pad, f_pad), jnp.bfloat16),
                   jax.ShapeDtypeStruct((n_pad, LANE), jnp.float32)),
        grid=(n_blk,),
        in_specs=[
            pl.BlockSpec((t, f_in_pad), lambda i: (i, 0)),
            pl.BlockSpec((f_in_pad, f_pad), lambda i: (0, 0)),
            pl.BlockSpec((f_pad, LANE), lambda i: (0, 0)),
        ],
        out_specs=[pl.BlockSpec((t, f_pad), lambda i: (i, 0)),
                   pl.BlockSpec((t, LANE), lambda i: (i, 0))],
        compiler_params=pltpu.CompilerParams(dimension_semantics=(row_sem,)),
    )(x, w, a_cat)

    s_row = scores[:, 0].reshape(1, n_pad)   # source scores s_j (lane-dense row)
    d_col = scores[:, 1:2]                   # dest scores d_i, (n_pad, 1)

    # ---- attention / aggregation kernel -------------------------------------
    nk = n_blk

    def d_map(qi, ki, cnt):    return (qi, 0)
    def s_map(qi, ki, cnt):    return (0, (qi + ki) % nk)
    def hk_map(qi, ki, cnt):   return ((qi + ki) % nk, 0)
    def bias_map(qi, ki, cnt): return (0, 0)
    def adj_map(qi, ki, cnt):  return (qi, (qi + ki) % nk)
    def out_map(qi, ki, cnt):  return (qi, 0)

    flops = 2 * n_pad * n_pad * f_pad + 8 * n_pad * n_pad
    bytes_accessed = (n_pad * n_pad                       # int8 adjacency
                      + n_pad * f_pad * 2 * n_blk         # h re-streamed per row block
                      + n_pad * f_pad * jnp.dtype(out_dtype).itemsize
                      + n_pad * 8)
    cost = pl.CostEstimate(flops=int(flops), transcendentals=int(n_pad * n_pad),
                           bytes_accessed=int(bytes_accessed))

    out = pl.pallas_call(
        functools.partial(_gat_attn_kernel, apply_relu=apply_relu, nk=nk),
        out_shape=jax.ShapeDtypeStruct((n_pad, f_pad), out_dtype),
        grid_spec=pltpu.PrefetchScalarGridSpec(
            num_scalar_prefetch=1,
            grid=(n_blk, nk),
            in_specs=[
                pl.BlockSpec((t, 1), d_map),       # dest scores d_i
                pl.BlockSpec((1, t), s_map),       # source scores s_j
                pl.BlockSpec((t, f_pad), hk_map),  # h (sources)
                pl.BlockSpec((1, f_pad), bias_map),
                pl.BlockSpec((t, t), adj_map),     # int8 adjacency tile
            ],
            out_specs=pl.BlockSpec((t, f_pad), out_map),
            scratch_shapes=[
                pltpu.VMEM((t, 1), jnp.float32),      # m (running max)
                pltpu.VMEM((t, 1), jnp.float32),      # l (running denom)
                pltpu.VMEM((t, f_pad), jnp.float32),  # acc
            ]),
        compiler_params=pltpu.CompilerParams(
            dimension_semantics=(row_sem, pltpu.ARBITRARY),
            vmem_limit_bytes=32 * 1024 * 1024),
        cost_estimate=cost,
    )(cnt_flat, d_col, s_row, h, bias, adj)
    return out


# --------------------------------------------------------------------------
# Graph / parameter helpers
# --------------------------------------------------------------------------
def build_graph(edge_index, n_pad, t_blk):
    """Dense int8 adjacency (adj[i,j]=1 iff edge j->i, plus self loops) and
    per-(row-block, rotated k-block) edge counts for block-sparse skipping."""
    src, dst = edge_index[0], edge_index[1]
    adj32 = jnp.zeros((n_pad, n_pad), jnp.int32)
    adj32 = adj32.at[dst, src].set(1)
    diag = jnp.arange(n_pad)
    adj32 = adj32.at[diag, diag].set(1)

    nb = n_pad // t_blk
    cnt = adj32.reshape(nb, t_blk, nb, t_blk).sum(axis=(1, 3))       # (nb, nb)
    # rotate so index 0 along k is the diagonal (self-loop) block for each row
    rot = (jnp.arange(nb)[:, None] + jnp.arange(nb)[None, :]) % nb
    cnt_rot = jnp.take_along_axis(cnt, rot, axis=1).reshape(-1).astype(jnp.int32)
    return adj32.astype(jnp.int8), cnt_rot


def _make_acat(a_src, a_dst, f_out, f_pad):
    a_cat = jnp.zeros((f_pad, LANE), jnp.float32)
    a_cat = a_cat.at[:f_out, 0].set(a_src[0])
    a_cat = a_cat.at[:f_out, 1].set(a_dst[0])
    return a_cat.astype(jnp.bfloat16)


def init_gat_params(key, f_in, f_out):
    k_w, k_s, k_d = jax.random.split(key, 3)
    scale_w = (6.0 / (f_in + f_out)) ** 0.5
    scale_a = (6.0 / (f_out + 1)) ** 0.5
    w = jax.random.uniform(k_w, (f_in, f_out), jnp.float32, -scale_w, scale_w)
    a_src = jax.random.uniform(k_s, (1, f_out), jnp.float32, -scale_a, scale_a)
    a_dst = jax.random.uniform(k_d, (1, f_out), jnp.float32, -scale_a, scale_a)
    bias = jnp.zeros((1, f_out), jnp.float32)
    return w, a_src, a_dst, bias


def gcn_forward(x, edge_index, params1, params2, hidden_dim, output_dim):
    n, f_in = x.shape
    n_pad = _round_up(n, LANE)
    f_in_pad = _round_up(f_in, LANE)       # lane-pad x's feature dim
    hid_pad = _round_up(hidden_dim, LANE)
    out_pad = _round_up(output_dim, LANE)

    w1, a1s, a1d, b1 = params1
    w2, a2s, a2d, b2 = params2

    xp = _pad_to(x, (n_pad, f_in_pad))
    w1p = _pad_to(w1, (f_in_pad, hid_pad))
    w2p = _pad_to(w2, (hid_pad, out_pad))
    b1p = _pad_to(b1, (1, hid_pad))
    b2p = _pad_to(b2, (1, out_pad))
    acat1 = _make_acat(a1s, a1d, hidden_dim, hid_pad)
    acat2 = _make_acat(a2s, a2d, output_dim, out_pad)

    t_blk = _pick_tile(n_pad)
    adj, cnt = build_graph(edge_index, n_pad, t_blk)   # built once, reused by both layers

    # TODO(synk): for very large sparse graphs, replace the dense (N,N) int8
    # adjacency with a packed bitmask / CSR block list driven through a
    # data-dependent index_map (skips the DMA too, not just the compute), add
    # pl.Buffered(3) on the adj/h streams for v5e, and fuse both layers into a
    # single pallas_call so adjacency is streamed once per forward.
    h1 = gat_layer(xp, w1p, acat1, b1p, adj, cnt,
                   t_blk=t_blk, apply_relu=True, out_dtype=jnp.bfloat16)   # conv1 + relu
    h2 = gat_layer(h1, w2p, acat2, b2p, adj, cnt,
                   t_blk=t_blk, apply_relu=False, out_dtype=jnp.float32)   # conv2
    return h2[:n, :output_dim]


if __name__ == "__main__":
    N, INPUT_DIM, HIDDEN_DIM, OUTPUT_DIM = 16, 8, 32, 4

    key = jax.random.PRNGKey(0)
    k_x, k_l1, k_l2 = jax.random.split(key, 3)

    # deterministic node features
    x = jax.random.normal(k_x, (N, INPUT_DIM), jnp.float32)

    # deterministic bidirectional ring graph: i <-> (i+1) % N
    idx = jnp.arange(N, dtype=jnp.int32)
    src = jnp.concatenate([idx, (idx + 1) % N])
    dst = jnp.concatenate([(idx + 1) % N, idx])
    edge_index = jnp.stack([src, dst], axis=0)  # (2, E)

    params1 = init_gat_params(k_l1, INPUT_DIM, HIDDEN_DIM)
    params2 = init_gat_params(k_l2, HIDDEN_DIM, OUTPUT_DIM)

    out = gcn_forward(x, edge_index, params1, params2,
                      hidden_dim=HIDDEN_DIM, output_dim=OUTPUT_DIM)
    jax.block_until_ready(out)
    assert out.shape == (N, OUTPUT_DIM)
    assert bool(jnp.all(jnp.isfinite(out)))

    # pure-JAX f32 reference (loose tolerance: bf16 MXU inputs + approx recip)
    adj_b = jnp.zeros((N, N), bool).at[dst, src].set(True)
    adj_b = adj_b.at[idx, idx].set(True)

    def gat_ref(xr, w, a_s, a_d, b):
        h = xr @ w
        s = h @ a_s[0]
        d = h @ a_d[0]
        e = d[:, None] + s[None, :]
        e = jnp.where(e > 0, e, NEG_SLOPE * e)
        e = jnp.where(adj_b, e, -jnp.inf)
        alpha = jax.nn.softmax(e, axis=-1)
        return alpha @ h + b

    ref = gat_ref(jnp.maximum(gat_ref(x, *params1), 0.0), *params2)
    err = float(jnp.max(jnp.abs(out - ref)))
    assert err < 0.15, f"max abs error vs f32 reference: {err}"
    print("KERNEL_OK")
</pallas_src>

<mosaic_0001>
module attributes {stable_mosaic.version = 11 : i64} {
  func.func @_proj_kernel(%arg0: i32, %arg1: memref<128x128xf32, #tpu.memory_space<vmem>>, %arg2: memref<128x128xf32, #tpu.memory_space<vmem>>, %arg3: memref<128x128xbf16, #tpu.memory_space<vmem>>, %arg4: memref<128x128xbf16, #tpu.memory_space<vmem>>, %arg5: memref<128x128xf32, #tpu.memory_space<vmem>>) attributes {dimension_semantics = [#tpu.dimension_semantics<parallel>], iteration_bounds = array<i64: 1>, scalar_prefetch = 0 : i64, scratch_operands = 0 : i64, tpu.core_type = #tpu.core_type<tc>, window_params = [{transform_indices = @transform_0, window_bounds = array<i64: 128, 128>}, {pipeline_mode = #tpu.pipeline_mode<synchronous>, transform_indices = @transform_1, window_bounds = array<i64: 128, 128>}, {pipeline_mode = #tpu.pipeline_mode<synchronous>, transform_indices = @transform_2, window_bounds = array<i64: 128, 128>}, {transform_indices = @transform_3, window_bounds = array<i64: 128, 128>}, {transform_indices = @transform_4, window_bounds = array<i64: 128, 128>}]} {
    %c0 = arith.constant 0 : index
    %c0_0 = arith.constant 0 : index
    %0 = vector.load %arg1[%c0, %c0_0] : memref<128x128xf32, #tpu.memory_space<vmem>>, vector<128x128xf32>
    %1 = arith.truncf %0 : vector<128x128xf32> to vector<128x128xbf16>
    %c0_1 = arith.constant 0 : index
    %c0_2 = arith.constant 0 : index
    %2 = vector.load %arg2[%c0_1, %c0_2] : memref<128x128xf32, #tpu.memory_space<vmem>>, vector<128x128xf32>
    %3 = arith.truncf %2 : vector<128x128xf32> to vector<128x128xbf16>
    %cst = arith.constant dense<0.000000e+00> : vector<128x128xf32>
    %4 = tpu.matmul %1, %3, %cst {dimension_numbers = #tpu.dot_dimension_numbers<[1], [0], [0], [1], [0, 0, 1, 1], [], []>} : vector<128x128xbf16>, vector<128x128xbf16>, vector<128x128xf32> -> vector<128x128xf32>
    %5 = arith.truncf %4 : vector<128x128xf32> to vector<128x128xbf16>
    %c0_3 = arith.constant 0 : index
    %c0_4 = arith.constant 0 : index
    %6 = vector.load %arg4[%c0_3, %c0_4] : memref<128x128xbf16, #tpu.memory_space<vmem>>, vector<128x128xbf16>
    tpu.vector_store %arg4[%c0_3, %c0_4], %5 {strides = array<i32>} : memref<128x128xbf16, #tpu.memory_space<vmem>>, vector<128x128xbf16>,
    %c0_5 = arith.constant 0 : index
    %c0_6 = arith.constant 0 : index
    %7 = vector.load %arg3[%c0_5, %c0_6] : memref<128x128xbf16, #tpu.memory_space<vmem>>, vector<128x128xbf16>
    %cst_7 = arith.constant dense<0.000000e+00> : vector<128x128xf32>
    %8 = tpu.matmul %5, %7, %cst_7 {dimension_numbers = #tpu.dot_dimension_numbers<[1], [0], [0], [1], [0, 0, 1, 1], [], []>} : vector<128x128xbf16>, vector<128x128xbf16>, vector<128x128xf32> -> vector<128x128xf32>
    %c0_8 = arith.constant 0 : index
    %c0_9 = arith.constant 0 : index
    %9 = vector.load %arg5[%c0_8, %c0_9] : memref<128x128xf32, #tpu.memory_space<vmem>>, vector<128x128xf32>
    tpu.vector_store %arg5[%c0_8, %c0_9], %8 {strides = array<i32>} : memref<128x128xf32, #tpu.memory_space<vmem>>, vector<128x128xf32>,
    return
  }
  func.func @transform_0(%arg0: i32) -> (i32, i32) {
    %c0_i32 = arith.constant 0 : i32
    %c0_i32_0 = arith.constant 0 : i32
    return %arg0, %c0_i32 : i32, i32
  }
  func.func @transform_1(%arg0: i32) -> (i32, i32) {
    %c0_i32 = arith.constant 0 : i32
    %c0_i32_0 = arith.constant 0 : i32
    %c0_i32_1 = arith.constant 0 : i32
    return %c0_i32, %c0_i32_0 : i32, i32
  }
  func.func @transform_2(%arg0: i32) -> (i32, i32) {
    %c0_i32 = arith.constant 0 : i32
    %c0_i32_0 = arith.constant 0 : i32
    %c0_i32_1 = arith.constant 0 : i32
    return %c0_i32, %c0_i32_0 : i32, i32
  }
  func.func @transform_3(%arg0: i32) -> (i32, i32) {
    %c0_i32 = arith.constant 0 : i32
    %c0_i32_0 = arith.constant 0 : i32
    return %arg0, %c0_i32 : i32, i32
  }
  func.func @transform_4(%arg0: i32) -> (i32, i32) {
    %c0_i32 = arith.constant 0 : i32
    %c0_i32_0 = arith.constant 0 : i32
    return %arg0, %c0_i32 : i32, i32
  }
}

</mosaic_0001>

<bundles_post_ra>
// kernel: tpu_custom_call.1
= control target key start
LH: loop header
LB: loop body
LE: loop exit
PB: predicated region body
PF: predicated region fallthrough
CT: control target
= control target key end

     0   :  { %10 = vsyncpa [#allocation3], 0  ;;  %s868_s0 = inlined_call_operand.hbm [shape: f32[128,128], index: 0, kind: input, shape index: {}]   ;;  %s869_s1 = inlined_call_operand.hbm [shape: f32[128,128], index: 1, kind: input, shape index: {}]   ;;  %s870_s2 = inlined_call_operand.hbm [shape: bf16[128,128], index: 2, kind: input, shape index: {}]   ;;  %s871_s3 = inlined_call_operand.hbm [shape: bf16[128,128], index: 3, kind: output, shape index: {0}]   ;;  %s872_s4 = inlined_call_operand.hbm [shape: f32[128,128], index: 4, kind: output, shape index: {1}]  }
   0x1   :  { %11 = vsyncpa [#allocation6], 0 }
   0x2   :  { %12 = vsyncpa [#allocation4], 0 }
   0x3   :  { %13 = vsyncpa [#allocation10], 0  ;;  %s804_s15 = smov [#allocation5]   ;;  %s805_s17 = smov [#allocation2]  }
   0x4   :  { %s31_s16 = sshll.u32 %s804_s15, 4  ;;  %s19_s18 = sshll.u32 %s805_s17, 4  ;;  %s32_s16 = int_to_ptr.vmem [resolvable:$true] %s31_s16  ;;  %s20_s18 = int_to_ptr.vmem [resolvable:$true] %s19_s18 }
   0x5   :  { %s704_s19 = scalar_lea.vmem %s32_s16, 2048  ;;  %p709_p1 = scmp.lt.s32.totalorder %s32_s16, %s32_s16 }
   0x6   :  { %p705_p0 = scmp.ne.s32.totalorder %s32_s16, %s704_s19  ;;  %p710_p2 = scmp.lt.s32.totalorder %s704_s19, %s704_s19 }
   0x8   :  { %p711_p3 = por %p710_p2, %p709_p1 }
   0xa   :  { %p712_p4 = pnand %p711_p3, %p705_p0 }
   0xc   :  { %715 = shalt.err (!%p712_p4)
}
   0xd   :  { %s806_s20 = smov 128   ;;  %s807_s21 = smov 8  }
   0xe   :  { %37 = dma.hbm_to_vmem [thread:$0]  %s869_s1, 2048, %s32_s16, [#allocation6], %s806_s20, %s806_s20, %s807_s21  }
   0xf   :  { %s724_s24 = scalar_lea.vmem %s20_s18, 2048  ;;  %p729_p6 = scmp.lt.s32.totalorder %s20_s18, %s20_s18 }
  0x10   :  { %p725_p5 = scmp.ne.s32.totalorder %s20_s18, %s724_s24  ;;  %p730_p7 = scmp.lt.s32.totalorder %s724_s24, %s724_s24 }
  0x12   :  { %p731_p8 = por %p730_p7, %p729_p6 }
  0x14   :  { %p732_p9 = pnand %p731_p8, %p725_p5 }
  0x16   :  { %735 = shalt.err (!%p732_p9)
}
  0x17   :  { %25 = dma.hbm_to_vmem [thread:$0]  %s868_s0, 2048, %s20_s18, [#allocation3], %s806_s20, %s806_s20, %s807_s21  }
  0x18   :  { %s808_s27 = smov [#allocation7]  }
  0x19   :  { %s43_s28 = sshll.u32 %s808_s27, 4  ;;  %s44_s28 = int_to_ptr.vmem [resolvable:$true] %s43_s28 }
  0x1a   :  { %s744_s29 = scalar_lea.vmem %s44_s28, 1024  ;;  %p749_p11 = scmp.lt.s32.totalorder %s44_s28, %s44_s28 }
  0x1b   :  { %p745_p10 = scmp.ne.s32.totalorder %s44_s28, %s744_s29  ;;  %p750_p12 = scmp.lt.s32.totalorder %s744_s29, %s744_s29 }
  0x1d   :  { %p751_p13 = por %p750_p12, %p749_p11 }
  0x1f   :  { %p752_p0 = pnand %p751_p13, %p745_p10 }
  0x21   :  { %755 = shalt.err (!%p752_p0)
}
  0x22   :  { %s809_s1 = smov 64   ;;  %s810_s30 = smov 4  }
  0x23   :  { %49 = dma.hbm_to_vmem [thread:$0]  %s870_s2, 1024, %s44_s28, [#allocation6], %s809_s1, %s809_s1, %s810_s30  }
  0x24   :  { %796 = dma.done.wait [#allocation3], 2048  }
  0x25   :  { %797 = vsyncadd [#allocation3], 4294965248 }
  0x26   :  { %798 = dma.done.wait [#allocation6], 3072  }
  0x27   :  { %799 = vsyncadd [#allocation6], 4294964224  ;;  %v98_v0 = vld [vmem:[#allocation5 + $0x70] sm:$0xff]  ;;  %v99_v1 = vld [vmem:[#allocation5 + $0x78] sm:$0xff]  ;;  %s811_s0 = smov [#allocation8]  }
  0x28   :  { %v96_v2 = vld [vmem:[#allocation5 + $0x60] sm:$0xff]  ;;  %v107_v3 = vpack.c.bf16 %v99_v1, %v98_v0  ;;  %v97_v4 = vld [vmem:[#allocation5 + $0x68] sm:$0xff]  ;;  %v94_v6 = vld [vmem:[#allocation5 + $0x50] sm:$0xff]  ;;  %s467_s2 = sshll.u32 %s811_s0, 4  ;;  %s468_s2 = int_to_ptr.vmem [resolvable:$true] %s467_s2 }
  0x29   :  { %v106_v5 = vpack.c.bf16 %v97_v4, %v96_v2  ;;  %v95_v7 = vld [vmem:[#allocation5 + $0x58] sm:$0xff]  ;;  %v60_v9 = vld [vmem:[#allocation2] sm:$0xff]  ;;  %v61_v10 = vld [vmem:[#allocation2 + $0x8] sm:$0xff]  ;;  %s756_s7 = scalar_lea.vmem %s468_s2, 1024  ;;  %p761_p2 = scmp.lt.s32.totalorder %s468_s2, %s468_s2 }
  0x2a   :  { %615 = vmatprep.subr.bf16.mxu0 %v107_v3  ;;  %v105_v8 = vpack.c.bf16 %v95_v7, %v94_v6  ;;  %v92_v11 = vld [vmem:[#allocation5 + $0x40] sm:$0xff]  ;;  %v93_v12 = vld [vmem:[#allocation5 + $0x48] sm:$0xff]  ;;  %v76_v13 = vpack.c.bf16 %v61_v10, %v60_v9  ;;  %v90_v15 = vld [vmem:[#allocation5 + $0x30] sm:$0xff]  ;;  %p757_p1 = scmp.ne.s32.totalorder %s468_s2, %s756_s7  ;;  %p762_p3 = scmp.lt.s32.totalorder %s756_s7, %s756_s7 }
  0x2b   :  { %616 = vmatpush3.bf16.msra.mxu0 %v107_v3  ;;  %v104_v14 = vpack.c.bf16 %v93_v12, %v92_v11  ;;  %v91_v16 = vld [vmem:[#allocation5 + $0x38] sm:$0xff]  ;;  %v689_v18 = vld [vmem:[#allocation7 + $0x30] sm:$0xff]   ;;  %v88_v20 = vld [vmem:[#allocation5 + $0x20] sm:$0xff] }
  0x2c   :  { %617 = vmatprep.subr.bf16.mxu0 %v106_v5  ;;  %631 = vmatprep.mubr.bf16.mxu0 %v76_v13  ;;  %v688_v17 = vld [vmem:[#allocation7 + $0x38] sm:$0xff]   ;;  %v103_v19 = vpack.c.bf16 %v91_v16, %v90_v15  ;;  %v89_v21 = vld [vmem:[#allocation5 + $0x28] sm:$0xff]  ;;  %v86_v24 = vld [vmem:[#allocation5 + $0x10] sm:$0xff]  ;;  %p763_p4 = por %p762_p3, %p761_p2 }
  0x2d   :  { %647 = vmatprep.subr.bf16.mxu1 %v688_v17  ;;  %v690_v22 = vld [vmem:[#allocation7 + $0x28] sm:$0xff]   ;;  %v102_v23 = vpack.c.bf16 %v89_v21, %v88_v20  ;;  %v87_v25 = vld [vmem:[#allocation5 + $0x18] sm:$0xff]  ;;  %v691_v26 = vld [vmem:[#allocation7 + $0x20] sm:$0xff]  }
  0x2e   :  { %648 = vmatpush3.bf16.msra.mxu1 %v688_v17  ;;  %v101_v27 = vpack.c.bf16 %v87_v25, %v86_v24  ;;  %v84_v28 = vld [vmem:[#allocation5] sm:$0xff]  ;;  %v85_v29 = vld [vmem:[#allocation5 + $0x8] sm:$0xff]  ;;  %v692_v30 = vld [vmem:[#allocation7 + $0x18] sm:$0xff]   ;;  %p764_p5 = pnand %p763_p4, %p757_p1 }
  0x2f   :  { %618 = vmatpush3.bf16.msra.mxu0 %v106_v5  ;;  %649 = vmatprep.subr.bf16.mxu1 %v689_v18  ;;  %v100_v31 = vpack.c.bf16 %v85_v29, %v84_v28  ;;  %v693_v32 = vld [vmem:[#allocation7 + $0x10] sm:$0xff]   ;;  %v63_v34 = vld [vmem:[#allocation2 + $0x18] sm:$0xff]  ;;  %v64_v35 = vld [vmem:[#allocation2 + $0x20] sm:$0xff] }
  0x30   :  { %619 = vmatprep.subr.bf16.mxu0 %v105_v8  ;;  %v62_v33 = vld [vmem:[#allocation2 + $0x10] sm:$0xff]  ;;  %v65_v36 = vld [vmem:[#allocation2 + $0x28] sm:$0xff]  ;;  %v67_v40 = vld [vmem:[#allocation2 + $0x38] sm:$0xff] }
  0x31   :  { %v77_v37 = vpack.c.bf16 %v63_v34, %v62_v33  ;;  %v78_v38 = vpack.c.bf16 %v65_v36, %v64_v35  ;;  %v66_v39 = vld [vmem:[#allocation2 + $0x30] sm:$0xff]  ;;  %v68_v41 = vld [vmem:[#allocation2 + $0x40] sm:$0xff]  ;;  %v69_v42 = vld [vmem:[#allocation2 + $0x48] sm:$0xff] }
  0x32   :  { %650 = vmatpush3.bf16.msra.mxu1 %v689_v18  ;;  %v79_v43 = vpack.c.bf16 %v67_v40, %v66_v39  ;;  %v80_v44 = vpack.c.bf16 %v69_v42, %v68_v41  ;;  %v70_v45 = vld [vmem:[#allocation2 + $0x50] sm:$0xff]  ;;  %v71_v46 = vld [vmem:[#allocation2 + $0x58] sm:$0xff]  ;;  %v72_v47 = vld [vmem:[#allocation2 + $0x60] sm:$0xff] }
  0x33   :  { %620 = vmatpush3.bf16.msra.mxu0 %v105_v8  ;;  %651 = vmatprep.subr.bf16.mxu1 %v690_v22  ;;  %v73_v48 = vld [vmem:[#allocation2 + $0x68] sm:$0xff]  ;;  %v81_v49 = vpack.c.bf16 %v71_v46, %v70_v45  ;;  %v74_v51 = vld [vmem:[#allocation2 + $0x70] sm:$0xff]  ;;  %v75_v52 = vld [vmem:[#allocation2 + $0x78] sm:$0xff] }
  0x34   :  { %621 = vmatprep.subr.bf16.mxu0 %v104_v14  ;;  %v82_v50 = vpack.c.bf16 %v73_v48, %v72_v47  ;;  %v83_v53 = vpack.c.bf16 %v75_v52, %v74_v51  ;;  %v694_v54 = vld [vmem:[#allocation7 + $0x8] sm:$0xff]   ;;  %v695_v55 = vld [vmem:[#allocation7] sm:$0xff]  }
  0x36   :  { %652 = vmatpush3.bf16.msra.mxu1 %v690_v22 }
  0x37   :  { %622 = vmatpush3.bf16.msra.mxu0 %v104_v14  ;;  %653 = vmatprep.subr.bf16.mxu1 %v691_v26 }
  0x38   :  { %623 = vmatprep.subr.bf16.mxu0 %v103_v19 }
  0x3a   :  { %654 = vmatpush3.bf16.msra.mxu1 %v691_v26 }
  0x3b   :  { %624 = vmatpush3.bf16.msra.mxu0 %v103_v19  ;;  %655 = vmatprep.subr.bf16.mxu1 %v692_v30 }
  0x3c   :  { %625 = vmatprep.subr.bf16.mxu0 %v102_v23 }
  0x3e   :  { %656 = vmatpush3.bf16.msra.mxu1 %v692_v30 }
  0x3f   :  { %626 = vmatpush3.bf16.msra.mxu0 %v102_v23  ;;  %657 = vmatprep.subr.bf16.mxu1 %v693_v32 }
  0x40   :  { %627 = vmatprep.subr.bf16.mxu0 %v101_v27 }
  0x42   :  { %658 = vmatpush3.bf16.msra.mxu1 %v693_v32 }
  0x43   :  { %628 = vmatpush3.bf16.msra.mxu0 %v101_v27  ;;  %659 = vmatprep.subr.bf16.mxu1 %v694_v54 }
  0x44   :  { %629 = vmatprep.subr.bf16.mxu0 %v100_v31 }
  0x46   :  { %660 = vmatpush3.bf16.msra.mxu1 %v694_v54 }
  0x47   :  { %630 = vmatpush3.bf16.msra.mxu0 %v100_v31  ;;  %661 = vmatprep.subr.bf16.mxu1 %v695_v55 }
  0x4a   :  { %632 = vmatmul.mubr.bf16.vlgmr.msra.gmra.mxu0 %v77_v37  ;;  %662 = vmatpush3.bf16.msra.mxu1 %v695_v55 }
  0x4b   :  { %635 = vmatprep.mubr.bf16.mxu0 %v78_v38 }
  0x52   :  { %636 = vmatmul.mubr.bf16.gmra.mxu0 %v79_v43 }
  0x53   :  { %639 = vmatprep.mubr.bf16.mxu0 %v80_v44 }
  0x5a   :  { %640 = vmatmul.mubr.bf16.gmra.mxu0 %v81_v49 }
  0x5b   :  { %643 = vmatprep.mubr.bf16.mxu0 %v82_v50 }
  0x62   :  { %644 = vmatmul.mubr.bf16.gmra.mxu0 %v83_v53 }
 0x10a   :  { %v633_v56 = vpop.f32.mrf.mxu0 }
 0x10c   :  { %v142_v57 = vpop.f32.mrf.mxu0 }
 0x10e   :  { %v634_v58 = vpop.f32.mrf.mxu0 }
 0x10f   :  { %v206_v59 = vpack.c.bf16 %v634_v58, %v633_v56 }
 0x110   :  { %v145_v60 = vpop.f32.mrf.mxu0 }
 0x111   :  { %576 = vst [vmem:[#allocation8 + $0x8] sm:$0xff] %v206_v59   ;;  %v205_v61 = vpack.c.bf16 %v145_v60, %v142_v57 }
 0x112   :  { %v637_v62 = vpop.f32.mrf.mxu0 }
 0x113   :  { %540 = vst [vmem:[#allocation8] sm:$0xff] %v205_v61   ;;  %663 = vmatprep.mubr.bf16.mxu1 %v205_v61 }
 0x114   :  { %v158_v63 = vpop.f32.mrf.mxu0  ;;  %664 = vmatmul.mubr.bf16.vlgmr.msra.gmra.mxu1 %v206_v59 }
 0x116   :  { %v638_v0 = vpop.f32.mrf.mxu0 }
 0x117   :  { %v208_v1 = vpack.c.bf16 %v638_v0, %v637_v62 }
 0x118   :  { %v161_v2 = vpop.f32.mrf.mxu0 }
 0x119   :  { %578 = vst [vmem:[#allocation8 + $0x18] sm:$0xff] %v208_v1   ;;  %v207_v3 = vpack.c.bf16 %v161_v2, %v158_v63 }
 0x11a   :  { %v641_v4 = vpop.f32.mrf.mxu0 }
 0x11b   :  { %577 = vst [vmem:[#allocation8 + $0x10] sm:$0xff] %v207_v3   ;;  %667 = vmatprep.mubr.bf16.mxu1 %v207_v3 }
 0x11c   :  { %v174_v5 = vpop.f32.mrf.mxu0  ;;  %668 = vmatmul.mubr.bf16.gmra.mxu1 %v208_v1 }
 0x11e   :  { %v642_v6 = vpop.f32.mrf.mxu0 }
 0x11f   :  { %v210_v7 = vpack.c.bf16 %v642_v6, %v641_v4 }
 0x120   :  { %v177_v8 = vpop.f32.mrf.mxu0 }
 0x121   :  { %580 = vst [vmem:[#allocation8 + $0x28] sm:$0xff] %v210_v7   ;;  %v209_v9 = vpack.c.bf16 %v177_v8, %v174_v5 }
 0x122   :  { %v645_v10 = vpop.f32.mrf.mxu0 }
 0x123   :  { %579 = vst [vmem:[#allocation8 + $0x20] sm:$0xff] %v209_v9   ;;  %671 = vmatprep.mubr.bf16.mxu1 %v209_v9 }
 0x124   :  { %v190_v11 = vpop.f32.mrf.mxu0  ;;  %672 = vmatmul.mubr.bf16.gmra.mxu1 %v210_v7 }
 0x126   :  { %v646_v12 = vpop.f32.mrf.mxu0 }
 0x127   :  { %v212_v13 = vpack.c.bf16 %v646_v12, %v645_v10 }
 0x128   :  { %v193_v14 = vpop.f32.mrf.mxu0 }
 0x129   :  { %582 = vst [vmem:[#allocation8 + $0x38] sm:$0xff] %v212_v13   ;;  %v211_v15 = vpack.c.bf16 %v193_v14, %v190_v11 }
 0x12b   :  { %581 = vst [vmem:[#allocation8 + $0x30] sm:$0xff] %v211_v15   ;;  %675 = vmatprep.mubr.bf16.mxu1 %v211_v15 }
 0x12c   :  { %676 = vmatmul.mubr.bf16.gmra.mxu1 %v212_v13 }
 0x12d   :  { %767 = shalt.err (!%p764_p5)
}
 0x12e   :  { %473 = dma.vmem_to_hbm [thread:$0]  %s468_s2, 1024, %s871_s3, [#allocation4], %s809_s1, %s809_s1, %s810_s30  }
 0x12f   :  { %s812_s3 = smov [#allocation9]  }
 0x130   :  { %s479_s10 = sshll.u32 %s812_s3, 4  ;;  %s480_s10 = int_to_ptr.vmem [resolvable:$true] %s479_s10 }
 0x131   :  { %s776_s11 = scalar_lea.vmem %s480_s10, 2048  ;;  %p781_p7 = scmp.lt.s32.totalorder %s480_s10, %s480_s10 }
 0x132   :  { %p777_p6 = scmp.ne.s32.totalorder %s480_s10, %s776_s11  ;;  %p782_p8 = scmp.lt.s32.totalorder %s776_s11, %s776_s11 }
 0x134   :  { %p783_p9 = por %p782_p8, %p781_p7 }
 0x136   :  { %p784_p10 = pnand %p783_p9, %p777_p6 }
 0x1d4   :  { %v665_v16 = vpop.f32.mrf.mxu1 }
 0x1d5   :  { %448 = vst [vmem:[#allocation9 + $0x10] sm:$0xff] %v665_v16 }
 0x1d6   :  { %v383_v17 = vpop.f32.mrf.mxu1 }
 0x1d7   :  { %446 = vst [vmem:[#allocation9] sm:$0xff] %v383_v17 }
 0x1d8   :  { %v666_v18 = vpop.f32.mrf.mxu1 }
 0x1d9   :  { %449 = vst [vmem:[#allocation9 + $0x18] sm:$0xff] %v666_v18 }
 0x1da   :  { %v386_v19 = vpop.f32.mrf.mxu1 }
 0x1db   :  { %447 = vst [vmem:[#allocation9 + $0x8] sm:$0xff] %v386_v19 }
 0x1dc   :  { %v669_v20 = vpop.f32.mrf.mxu1 }
 0x1dd   :  { %452 = vst [vmem:[#allocation9 + $0x30] sm:$0xff] %v669_v20 }
 0x1de   :  { %v399_v21 = vpop.f32.mrf.mxu1 }
 0x1df   :  { %450 = vst [vmem:[#allocation9 + $0x20] sm:$0xff] %v399_v21 }
 0x1e0   :  { %v670_v22 = vpop.f32.mrf.mxu1 }
 0x1e1   :  { %453 = vst [vmem:[#allocation9 + $0x38] sm:$0xff] %v670_v22 }
 0x1e2   :  { %v402_v23 = vpop.f32.mrf.mxu1 }
 0x1e3   :  { %451 = vst [vmem:[#allocation9 + $0x28] sm:$0xff] %v402_v23 }
 0x1e4   :  { %v673_v24 = vpop.f32.mrf.mxu1 }
 0x1e5   :  { %456 = vst [vmem:[#allocation9 + $0x50] sm:$0xff] %v673_v24 }
 0x1e6   :  { %v415_v25 = vpop.f32.mrf.mxu1 }
 0x1e7   :  { %454 = vst [vmem:[#allocation9 + $0x40] sm:$0xff] %v415_v25 }
 0x1e8   :  { %v674_v26 = vpop.f32.mrf.mxu1 }
 0x1e9   :  { %457 = vst [vmem:[#allocation9 + $0x58] sm:$0xff] %v674_v26 }
 0x1ea   :  { %v418_v27 = vpop.f32.mrf.mxu1 }
 0x1eb   :  { %455 = vst [vmem:[#allocation9 + $0x48] sm:$0xff] %v418_v27 }
 0x1ec   :  { %v677_v28 = vpop.f32.mrf.mxu1 }
 0x1ed   :  { %460 = vst [vmem:[#allocation9 + $0x70] sm:$0xff] %v677_v28 }
 0x1ee   :  { %v431_v29 = vpop.f32.mrf.mxu1 }
 0x1ef   :  { %458 = vst [vmem:[#allocation9 + $0x60] sm:$0xff] %v431_v29 }
 0x1f0   :  { %v678_v30 = vpop.f32.mrf.mxu1 }
 0x1f1   :  { %461 = vst [vmem:[#allocation9 + $0x78] sm:$0xff] %v678_v30 }
 0x1f2   :  { %v434_v31 = vpop.f32.mrf.mxu1 }
 0x1f3   :  { %459 = vst [vmem:[#allocation9 + $0x68] sm:$0xff] %v434_v31 }
 0x1f4   :  { %787 = shalt.err (!%p784_p10)
}
 0x1f5   :  { %485 = dma.vmem_to_hbm [thread:$0]  %s480_s10, 2048, %s872_s4, [#allocation10], %s806_s20, %s806_s20, %s807_s21  }
 0x1f6   :  { %800 = dma.done.wait [#allocation4], 1024  }
 0x1f7   :  { %801 = vsyncadd [#allocation4], 4294966272 }
 0x1f8   :  { %802 = dma.done.wait [#allocation10], 2048  }
 0x1f9   :  { %803 = vsyncadd [#allocation10], 4294965248 }
 0x1fa   :  { %492 = vsyncpa [#allocation3], 1 }
 0x1fb   :  { %493 = vsyncpa [#allocation6], 1 }
 0x1fc   :  { %494 = vsyncpa [#allocation4], 1 }
 0x1fd   :  { %495 = vsyncpa [#allocation10], 1 }

</bundles_post_ra>
